<compile_context>
chip_gen: v5e
topology: v5e:2x2
jax: 0.10.0
libtpu: 0.0.40
codegen_flags: <defaults>
</compile_context>

<pallas_src>
import functools
import numpy as np

import jax
import jax.numpy as jnp
from jax import lax
from jax.experimental import pallas as pl
from jax.experimental.pallas import tpu as pltpu


# ---------------- synthetic configuration (small shapes) ----------------
ENTITY_LABELS = {'O': 0, 'B-PER': 1, 'I-PER': 2, 'B-ORG': 3, 'I-ORG': 4,
                 'B-LOC': 5, 'I-LOC': 6}
NUM_LABELS = len(ENTITY_LABELS)          # 7
LABEL_SIZE = NUM_LABELS + 2              # 9 (+ <SOS>, <EOS>)
START = LABEL_SIZE - 2
END = LABEL_SIZE - 1
NEG = -100.0

B = 2     # batch
P = 12    # word pieces per sentence (incl. [CLS] at index 0)
T = 8     # max token number
D = 32    # "bert" hidden dim


# ---------------- helpers copied from the reference (glue) ----------------
def token_lens_to_offsets(token_lens):
    max_token_num = max(len(x) for x in token_lens)
    offsets = []
    for seq_token_lens in token_lens:
        seq_offsets = [0]
        for l in seq_token_lens[:-1]:
            seq_offsets.append(seq_offsets[-1] + l)
        offsets.append(seq_offsets + [-1] * (max_token_num - len(seq_offsets)))
    return offsets


def make_crf_transition(label_vocab, key):
    """Deterministic CRF transition matrix: randn + CRF.initialize() masking."""
    label_size = len(label_vocab) + 2
    start, end = label_size - 2, label_size - 1
    trans = np.array(jax.device_get(
        jax.random.normal(key, (label_size, label_size), jnp.float32)))
    trans[:, end] = NEG
    trans[start, :] = NEG
    for label, idx in label_vocab.items():
        if label.startswith('I-') or label.startswith('E-'):
            trans[idx, start] = NEG
        if label.startswith('B-') or label.startswith('I-'):
            trans[end, idx] = NEG
    for lf, lfi in label_vocab.items():
        lfp, lft = ('O', 'O') if lf == 'O' else lf.split('-', 1)
        for lt, lti in label_vocab.items():
            ltp, ltt = ('O', 'O') if lt == 'O' else lt.split('-', 1)
            allowed = (ltp in ('B', 'O')) or \
                      (lfp in ('B', 'I') and ltp == 'I' and lft == ltt)
            if not allowed:
                trans[lti, lfi] = NEG
    return jnp.asarray(trans, jnp.float32)


# -------- fused Pallas kernel: FFN + gather + pad_logits + CRF loglik --------
# meta rows are time-major within the batch block: row r = t * bblk + b.
#   ch0: gather target column       = b_in_block * P + first_piece_offset + 1
#   ch1: ext[t+1]  (gold label if t < len else <EOS>)
#   ch2: ext[t]    (<SOS> if t == 0 else ext[t] of the previous step)
#   ch3: seq mask  (t < len)
#   ch4: prev mask (t < len + 1)
#   ch5: sentence index within the batch block
def _fused_crf_kernel(meta_ref, pieces_ref, w_ref, trans_ref, out_ref, *,
                      num_labels, tn, bblk):
    m = meta_ref.shape[1]          # tn * bblk
    kdim = pieces_ref.shape[1]     # bblk * P
    lp = w_ref.shape[1]
    start, end = lp - 2, lp - 1

    meta = meta_ref[0]             # (m, 6) int32 -- single tiny DMA per step
    tgt_col = meta[:, 0:1]
    cur_col = meta[:, 1:2]
    prev_col = meta[:, 2:3]
    smask_col = meta[:, 3:4]
    pmask_col = meta[:, 4:5]
    bidx_col = meta[:, 5:6]

    pieces = pieces_ref[0]         # (bblk*P, D) f32
    w = w_ref[...]                 # (D, Lp)   zero-padded <SOS>/<EOS> cols
    trans = trans_ref[...]         # (Lp, Lp)  transition[to, from]

    # ---- entity_label_ffn BEFORE the gather (both are linear) ----
    proj = jnp.dot(pieces, w, preferred_element_type=jnp.float32)          # (bblk*P, Lp)

    # ---- encode(): multi_piece == 'first' gather as one one-hot matmul ----
    # Padded tokens (offset == -1) pick their sentence's [CLS] piece; they are
    # masked out of every score below, so this is benign.
    c_iota = lax.broadcasted_iota(jnp.int32, (m, kdim), 1)
    gather_oh = (c_iota == tgt_col).astype(jnp.float32)                    # (m, bblk*P)
    scores = jnp.dot(gather_oh, proj, preferred_element_type=jnp.float32)  # (m, Lp)

    # ---- CRF.pad_logits ----
    col = lax.broadcasted_iota(jnp.int32, (m, lp), 1)
    logits = jnp.where(col >= num_labels, jnp.float32(NEG), scores)        # (m, Lp)

    # ---- partition function (forward algorithm) ----
    # alpha'[b,j] = logit[b,j] + LSE_i(alpha[b,i] + trans[j,i])
    #            = logit[b,j] + mx_b + log((exp(alpha - mx) @ exp(trans).T)[b,j])
    exp_trans_t = jnp.exp(trans).T                                          # (Lp, Lp), hoisted
    lane = lax.broadcasted_iota(jnp.int32, (bblk, lp), 1)
    alpha = jnp.where(lane == start, jnp.float32(0.0), jnp.float32(NEG))    # (bblk, Lp)
    for t in range(tn):   # static unroll (T small); fori_loop at production T
        lo = t * bblk
        logit_t = logits[lo:lo + bblk, :]                                   # (bblk, Lp) contiguous
        gate_t = smask_col[lo:lo + bblk, :] > 0                             # (bblk, 1)
        mx = jnp.max(alpha, axis=1, keepdims=True)                          # (bblk, 1)
        s = jnp.dot(jnp.exp(alpha - mx), exp_trans_t,
                    preferred_element_type=jnp.float32)                     # (bblk, Lp)
        alpha_nxt = mx + jnp.log(jnp.maximum(s, jnp.float32(1e-30))) + logit_t
        alpha = jnp.where(gate_t, alpha_nxt, alpha)
    alpha = alpha + trans[end:end + 1, :]                                   # (bblk, Lp)
    mx = jnp.max(alpha, axis=1, keepdims=True)
    norm_col = mx + jnp.log(jnp.sum(jnp.exp(alpha - mx), axis=1,
                                    keepdims=True))                         # (bblk, 1)

    # ---- gold score (unary + binary), fully vectorized over (t, b) rows ----
    smask_f = smask_col.astype(jnp.float32)
    pmask_f = pmask_col.astype(jnp.float32)
    cur_oh = (col == cur_col).astype(jnp.float32)                           # onehot(ext[t+1])
    prev_oh = (col == prev_col).astype(jnp.float32)                         # onehot(ext[t])
    unary_rows = jnp.sum(logits * cur_oh, axis=1, keepdims=True) * smask_f  # (m, 1)
    rows = jnp.dot(cur_oh, trans, preferred_element_type=jnp.float32)       # trans[ext[t+1], :]
    binary_rows = jnp.sum(rows * prev_oh, axis=1, keepdims=True) * pmask_f  # (m, 1)
    total_rows = unary_rows + binary_rows                                   # (m, 1)

    # per-sentence sum over time -> lane-dense (1, bblk)
    bsel = (lax.broadcasted_iota(jnp.int32, (m, bblk), 1)
            == bidx_col).astype(jnp.float32)                                # (m, bblk)
    gold_row = jnp.sum(total_rows * bsel, axis=0, keepdims=True)            # (1, bblk)

    # final <EOS> transition (only when the sentence fills all tn tokens),
    # minus the partition function; (bblk,1)->(1,bblk) via select + reduce.
    lo = (tn - 1) * bblk
    last_col = smask_f[lo:, :] * jnp.sum(trans[end:end + 1, :] * cur_oh[lo:, :],
                                         axis=1, keepdims=True)             # (bblk, 1)
    tail_col = last_col - norm_col                                          # (bblk, 1)
    eye_b = (lax.broadcasted_iota(jnp.int32, (bblk, bblk), 0) ==
             lax.broadcasted_iota(jnp.int32, (bblk, bblk), 1)).astype(jnp.float32)
    tail_row = jnp.sum(tail_col * eye_b, axis=0, keepdims=True)             # (1, bblk)

    out_ref[0] = gold_row + tail_row                                        # loglik, lane-dense


# ---------------- model forward (single fused pallas_call) ------------------
def _pick_batch_block(b):
    for cand in (8, 4, 2, 1):
        if cand <= b and b % cand == 0:
            return cand
    return 1


def structural_model_forward(bert_piece_outputs, token_offsets,
                             entity_label_idxs, token_nums, params):
    """Returns training loss = -mean(CRF loglik), like StructuralModel.forward."""
    b, p, d = bert_piece_outputs.shape
    t = token_offsets.shape[1]
    lp = params['transition'].shape[0]
    start, end = lp - 2, lp - 1
    num_labels = lp - 2

    bblk = _pick_batch_block(b)    # TODO(synk): pad B to a multiple of 8 at production
    nb = b // bblk
    m = t * bblk

    off = token_offsets.astype(jnp.int32)                       # (b, t)
    lbl = entity_label_idxs.astype(jnp.int32)                    # (b, t)
    lens = token_nums.astype(jnp.int32)                          # (b,)

    # host-side integer glue, packed into ONE int32 meta array (1 DMA / step)
    t_idx = jnp.arange(t, dtype=jnp.int32)[None, :]
    smask = (t_idx < lens[:, None]).astype(jnp.int32)            # t < len
    pmask = (t_idx < (lens[:, None] + 1)).astype(jnp.int32)      # t < len + 1
    cur_ext = jnp.where(smask > 0, lbl, jnp.int32(end))          # ext[t+1]
    prev_ext = jnp.concatenate(
        [jnp.full((b, 1), start, jnp.int32), cur_ext[:, :-1]], axis=1)  # ext[t]
    b_in_blk = (jnp.arange(b, dtype=jnp.int32) % bblk)[:, None]
    gather_tgt = b_in_blk * p + off + 1                          # in-block piece column
    bidx = jnp.broadcast_to(b_in_blk, (b, t))

    def to_tm(x):  # (b, t) -> (nb, t*bblk, 1), time-major inside each block
        return x.reshape(nb, bblk, t).transpose(0, 2, 1).reshape(nb, m, 1)

    meta = jnp.concatenate(
        [to_tm(gather_tgt), to_tm(cur_ext), to_tm(prev_ext),
         to_tm(smask), to_tm(pmask), to_tm(bidx)], axis=2)       # (nb, m, 6) int32

    pieces = bert_piece_outputs.reshape(nb, bblk * p, d)         # (nb, bblk*P, D)

    loglik = pl.pallas_call(
        functools.partial(_fused_crf_kernel,
                          num_labels=num_labels, tn=t, bblk=bblk),
        out_shape=jax.ShapeDtypeStruct((nb, 1, bblk), jnp.float32),
        grid=(nb,),
        in_specs=[
            pl.BlockSpec((1, m, 6), lambda i: (i, 0, 0)),        # packed int metadata
            pl.BlockSpec((1, bblk * p, d), lambda i: (i, 0, 0)),  # word-piece feats
            pl.BlockSpec((d, lp), lambda i: (0, 0)),             # FFN weight (padded)
            pl.BlockSpec((lp, lp), lambda i: (0, 0)),            # CRF transition
        ],
        out_specs=pl.BlockSpec((1, 1, bblk), lambda i: (i, 0, 0)),  # lane-dense loglik
        compiler_params=pltpu.CompilerParams(
            dimension_semantics=("parallel",)),                  # v7x: 2 TCs share blocks
    )(meta, pieces, params['w_pad'], params['transition'])

    return -jnp.mean(loglik.reshape(b))


# ---------------- pure-JAX reference for verification -----------------------
def reference_loss(pieces, offsets, labels, lens, w, trans):
    idx = jnp.broadcast_to((offsets + 1)[:, :, None], (B, T, D))
    feats = jnp.take_along_axis(pieces, idx, axis=1)
    scores = jnp.einsum('btd,dl->btl', feats, w)
    logits = jnp.concatenate(
        [scores, jnp.full((B, T, 2), NEG, jnp.float32)], axis=-1)
    lp, start, end = LABEL_SIZE, START, END
    lens = lens.astype(jnp.int32)

    def lse(x, axis):
        m = jnp.max(x, axis=axis)
        return m + jnp.log(jnp.sum(jnp.exp(x - jnp.expand_dims(m, axis)), axis=axis))

    alpha = jnp.full((B, lp), NEG, jnp.float32).at[:, start].set(0.0)

    def step(carry, logit):
        a, l = carry
        mat = logit[:, :, None] + a[:, None, :] + trans[None, :, :]
        a_nxt = lse(mat, 2)
        m = (l > 0).astype(jnp.float32)[:, None]
        return (m * a_nxt + (1 - m) * a, l - 1), None

    (alpha, _), _ = jax.lax.scan(step, (alpha, lens),
                                 jnp.transpose(logits, (1, 0, 2)))
    alpha = alpha + trans[end][None, :]
    norm = lse(alpha, 1)

    unary = jnp.take_along_axis(logits, labels[:, :, None], axis=2)[:, :, 0]
    seq_mask = (jnp.arange(T)[None, :] < lens[:, None]).astype(jnp.float32)
    unary_score = jnp.sum(unary * seq_mask, axis=1)

    labels_ext = jnp.concatenate(
        [jnp.full((B, 1), start, labels.dtype), labels,
         jnp.full((B, 1), end, labels.dtype)], axis=1)
    mask_ext = jnp.arange(T + 2)[None, :] < (lens[:, None] + 1)
    labels_ext = jnp.where(mask_ext, labels_ext, end)
    prev, nxt = labels_ext[:, :-1], labels_ext[:, 1:]
    trn_scr = trans[nxt, prev]
    bmask = (jnp.arange(T + 1)[None, :] < (lens[:, None] + 1)).astype(jnp.float32)
    binary_score = jnp.sum(trn_scr * bmask, axis=1)

    loglik = unary_score + binary_score - norm
    return -jnp.mean(loglik)


# ---------------- main -------------------------------------------------------
if __name__ == "__main__":
    key = jax.random.PRNGKey(0)
    k1, k2, k3, k4 = jax.random.split(key, 4)

    # synthetic inputs / parameters (deterministic)
    bert_piece_outputs = jax.random.normal(k1, (B, P, D), jnp.float32)
    w = 0.1 * jax.random.normal(k2, (D, NUM_LABELS), jnp.float32)   # FFN weight, no bias
    w_pad = jnp.concatenate([w, jnp.zeros((D, 2), jnp.float32)], axis=1)
    transition = make_crf_transition(ENTITY_LABELS, k3)

    token_lens = [[1, 2, 1, 1, 1, 1, 2, 1], [2, 1, 1, 1, 1]]
    token_offsets = jnp.asarray(token_lens_to_offsets(token_lens), jnp.int32)  # (B, T)
    token_nums = jnp.asarray([len(x) for x in token_lens], jnp.int32)          # (B,)
    entity_label_idxs = jax.random.randint(k4, (B, T), 0, NUM_LABELS, jnp.int32)

    params = {'w_pad': w_pad, 'transition': transition}

    loss = structural_model_forward(bert_piece_outputs, token_offsets,
                                    entity_label_idxs, token_nums, params)
    loss = jax.block_until_ready(loss)

    ref = reference_loss(bert_piece_outputs, token_offsets, entity_label_idxs,
                         token_nums, w, transition)
    assert jnp.allclose(loss, ref, atol=5e-3, rtol=1e-3), (float(loss), float(ref))
    print("KERNEL_OK")
</pallas_src>

<mosaic_0001>
module attributes {stable_mosaic.version = 11 : i64} {
  func.func @_fused_crf_kernel(%arg0: i32, %arg1: memref<1x16x6xi32, #tpu.memory_space<vmem>>, %arg2: memref<1x24x32xf32, #tpu.memory_space<vmem>>, %arg3: memref<32x9xf32, #tpu.memory_space<vmem>>, %arg4: memref<9x9xf32, #tpu.memory_space<vmem>>, %arg5: memref<1x1x2xf32, #tpu.memory_space<vmem>>) attributes {dimension_semantics = [#tpu.dimension_semantics<parallel>], iteration_bounds = array<i64: 1>, scalar_prefetch = 0 : i64, scratch_operands = 0 : i64, tpu.core_type = #tpu.core_type<tc>, window_params = [{transform_indices = @transform_0, window_bounds = array<i64: 1, 16, 6>}, {transform_indices = @transform_1, window_bounds = array<i64: 1, 24, 32>}, {pipeline_mode = #tpu.pipeline_mode<synchronous>, transform_indices = @transform_2, window_bounds = array<i64: 32, 9>}, {pipeline_mode = #tpu.pipeline_mode<synchronous>, transform_indices = @transform_3, window_bounds = array<i64: 9, 9>}, {transform_indices = @transform_4, window_bounds = array<i64: 1, 1, 2>}]} {
    %c0 = arith.constant 0 : index
    %c0_0 = arith.constant 0 : index
    %c0_1 = arith.constant 0 : index
    %0 = vector.load %arg1[%c0, %c0_0, %c0_1] : memref<1x16x6xi32, #tpu.memory_space<vmem>>, vector<1x16x6xi32>
    %1 = vector.shape_cast %0 : vector<1x16x6xi32> to vector<16x6xi32>
    %2 = vector.extract_strided_slice %1 {offsets = [0, 0], sizes = [16, 1], strides = [1, 1]} : vector<16x6xi32> to vector<16x1xi32>
    %3 = vector.extract_strided_slice %1 {offsets = [0, 1], sizes = [16, 1], strides = [1, 1]} : vector<16x6xi32> to vector<16x1xi32>
    %4 = vector.extract_strided_slice %1 {offsets = [0, 2], sizes = [16, 1], strides = [1, 1]} : vector<16x6xi32> to vector<16x1xi32>
    %5 = vector.extract_strided_slice %1 {offsets = [0, 3], sizes = [16, 1], strides = [1, 1]} : vector<16x6xi32> to vector<16x1xi32>
    %6 = vector.extract_strided_slice %1 {offsets = [0, 4], sizes = [16, 1], strides = [1, 1]} : vector<16x6xi32> to vector<16x1xi32>
    %7 = vector.extract_strided_slice %1 {offsets = [0, 5], sizes = [16, 1], strides = [1, 1]} : vector<16x6xi32> to vector<16x1xi32>
    %c0_2 = arith.constant 0 : index
    %c0_3 = arith.constant 0 : index
    %c0_4 = arith.constant 0 : index
    %8 = vector.load %arg2[%c0_2, %c0_3, %c0_4] : memref<1x24x32xf32, #tpu.memory_space<vmem>>, vector<1x24x32xf32>
    %9 = vector.shape_cast %8 : vector<1x24x32xf32> to vector<24x32xf32>
    %c0_5 = arith.constant 0 : index
    %c0_6 = arith.constant 0 : index
    %10 = vector.load %arg3[%c0_5, %c0_6] : memref<32x9xf32, #tpu.memory_space<vmem>>, vector<32x9xf32>
    %c0_7 = arith.constant 0 : index
    %c0_8 = arith.constant 0 : index
    %11 = vector.load %arg4[%c0_7, %c0_8] : memref<9x9xf32, #tpu.memory_space<vmem>>, vector<9x9xf32>
    %cst = arith.constant dense<0.000000e+00> : vector<24x9xf32>
    %12 = tpu.matmul %9, %10, %cst {dimension_numbers = #tpu.dot_dimension_numbers<[1], [0], [0], [1], [0, 0, 1, 1], [], []>} : vector<24x32xf32>, vector<32x9xf32>, vector<24x9xf32> -> vector<24x9xf32>
    %13 = tpu.iota {dimensions = array<i32: 1>} : vector<16x24xi32>
    %14 = vector.broadcast %2 : vector<16x1xi32> to vector<16x24xi32>
    %15 = arith.cmpi eq, %13, %14 : vector<16x24xi32>
    %16 = arith.extui %15 : vector<16x24xi1> to vector<16x24xi32>
    %17 = arith.sitofp %16 : vector<16x24xi32> to vector<16x24xf32>
    %cst_9 = arith.constant dense<0.000000e+00> : vector<16x9xf32>
    %18 = tpu.matmul %17, %12, %cst_9 {dimension_numbers = #tpu.dot_dimension_numbers<[1], [0], [0], [1], [0, 0, 1, 1], [], []>} : vector<16x24xf32>, vector<24x9xf32>, vector<16x9xf32> -> vector<16x9xf32>
    %19 = tpu.iota {dimensions = array<i32: 1>} : vector<16x9xi32>
    %c7_i32 = arith.constant 7 : i32
    %20 = vector.broadcast %c7_i32 : i32 to vector<16x9xi32>
    %21 = arith.cmpi sge, %19, %20 : vector<16x9xi32>
    %cst_10 = arith.constant -1.000000e+02 : f32
    %22 = vector.broadcast %cst_10 : f32 to vector<16x9xf32>
    %23 = arith.select %21, %22, %18 : vector<16x9xi1>, vector<16x9xf32>
    %24 = math.exp %11 : vector<9x9xf32>
    %25 = tpu.transpose %24, [1, 0] : vector<9x9xf32> -> vector<9x9xf32>
    %26 = tpu.iota {dimensions = array<i32: 1>} : vector<2x9xi32>
    %c7_i32_11 = arith.constant 7 : i32
    %27 = vector.broadcast %c7_i32_11 : i32 to vector<2x9xi32>
    %28 = arith.cmpi eq, %26, %27 : vector<2x9xi32>
    %cst_12 = arith.constant 0.000000e+00 : f32
    %cst_13 = arith.constant -1.000000e+02 : f32
    %29 = vector.broadcast %cst_12 : f32 to vector<2x9xf32>
    %30 = vector.broadcast %cst_13 : f32 to vector<2x9xf32>
    %31 = arith.select %28, %29, %30 : vector<2x9xi1>, vector<2x9xf32>
    %32 = vector.extract_strided_slice %23 {offsets = [0, 0], sizes = [2, 9], strides = [1, 1]} : vector<16x9xf32> to vector<2x9xf32>
    %33 = vector.extract_strided_slice %5 {offsets = [0, 0], sizes = [2, 1], strides = [1, 1]} : vector<16x1xi32> to vector<2x1xi32>
    %c0_i32 = arith.constant 0 : i32
    %34 = vector.broadcast %c0_i32 : i32 to vector<2x1xi32>
    %35 = arith.cmpi sgt, %33, %34 : vector<2x1xi32>
    %cst_14 = arith.constant dense<0xFF800000> : vector<2xf32>
    %36 = vector.multi_reduction <maximumf>, %31, %cst_14 [1] : vector<2x9xf32> to vector<2xf32>
    %37 = vector.shape_cast %36 : vector<2xf32> to vector<2x1xf32>
    %38 = vector.broadcast %37 : vector<2x1xf32> to vector<2x9xf32>
    %39 = arith.subf %31, %38 : vector<2x9xf32>
    %40 = math.exp %39 : vector<2x9xf32>
    %cst_15 = arith.constant dense<0.000000e+00> : vector<2x9xf32>
    %41 = tpu.matmul %40, %25, %cst_15 {dimension_numbers = #tpu.dot_dimension_numbers<[1], [0], [0], [1], [0, 0, 1, 1], [], []>} : vector<2x9xf32>, vector<9x9xf32>, vector<2x9xf32> -> vector<2x9xf32>
    %cst_16 = arith.constant 1.000000e-30 : f32
    %42 = vector.broadcast %cst_16 : f32 to vector<2x9xf32>
    %43 = arith.maximumf %41, %42 : vector<2x9xf32>
    %44 = math.log %43 : vector<2x9xf32>
    %45 = vector.broadcast %37 : vector<2x1xf32> to vector<2x9xf32>
    %46 = arith.addf %45, %44 : vector<2x9xf32>
    %47 = arith.addf %46, %32 : vector<2x9xf32>
    %48 = vector.shape_cast %35 : vector<2x1xi1> to vector<2x1xi1>
    %49 = vector.broadcast %48 : vector<2x1xi1> to vector<2x9xi1>
    %50 = arith.select %49, %47, %31 : vector<2x9xi1>, vector<2x9xf32>
    %51 = vector.extract_strided_slice %23 {offsets = [2, 0], sizes = [2, 9], strides = [1, 1]} : vector<16x9xf32> to vector<2x9xf32>
    %52 = vector.extract_strided_slice %5 {offsets = [2, 0], sizes = [2, 1], strides = [1, 1]} : vector<16x1xi32> to vector<2x1xi32>
    %c0_i32_17 = arith.constant 0 : i32
    %53 = vector.broadcast %c0_i32_17 : i32 to vector<2x1xi32>
    %54 = arith.cmpi sgt, %52, %53 : vector<2x1xi32>
    %cst_18 = arith.constant dense<0xFF800000> : vector<2xf32>
    %55 = vector.multi_reduction <maximumf>, %50, %cst_18 [1] : vector<2x9xf32> to vector<2xf32>
    %56 = vector.shape_cast %55 : vector<2xf32> to vector<2x1xf32>
    %57 = vector.broadcast %56 : vector<2x1xf32> to vector<2x9xf32>
    %58 = arith.subf %50, %57 : vector<2x9xf32>
    %59 = math.exp %58 : vector<2x9xf32>
    %cst_19 = arith.constant dense<0.000000e+00> : vector<2x9xf32>
    %60 = tpu.matmul %59, %25, %cst_19 {dimension_numbers = #tpu.dot_dimension_numbers<[1], [0], [0], [1], [0, 0, 1, 1], [], []>} : vector<2x9xf32>, vector<9x9xf32>, vector<2x9xf32> -> vector<2x9xf32>
    %cst_20 = arith.constant 1.000000e-30 : f32
    %61 = vector.broadcast %cst_20 : f32 to vector<2x9xf32>
    %62 = arith.maximumf %60, %61 : vector<2x9xf32>
    %63 = math.log %62 : vector<2x9xf32>
    %64 = vector.broadcast %56 : vector<2x1xf32> to vector<2x9xf32>
    %65 = arith.addf %64, %63 : vector<2x9xf32>
    %66 = arith.addf %65, %51 : vector<2x9xf32>
    %67 = vector.shape_cast %54 : vector<2x1xi1> to vector<2x1xi1>
    %68 = vector.broadcast %67 : vector<2x1xi1> to vector<2x9xi1>
    %69 = arith.select %68, %66, %50 : vector<2x9xi1>, vector<2x9xf32>
    %70 = vector.extract_strided_slice %23 {offsets = [4, 0], sizes = [2, 9], strides = [1, 1]} : vector<16x9xf32> to vector<2x9xf32>
    %71 = vector.extract_strided_slice %5 {offsets = [4, 0], sizes = [2, 1], strides = [1, 1]} : vector<16x1xi32> to vector<2x1xi32>
    %c0_i32_21 = arith.constant 0 : i32
    %72 = vector.broadcast %c0_i32_21 : i32 to vector<2x1xi32>
    %73 = arith.cmpi sgt, %71, %72 : vector<2x1xi32>
    %cst_22 = arith.constant dense<0xFF800000> : vector<2xf32>
    %74 = vector.multi_reduction <maximumf>, %69, %cst_22 [1] : vector<2x9xf32> to vector<2xf32>
    %75 = vector.shape_cast %74 : vector<2xf32> to vector<2x1xf32>
    %76 = vector.broadcast %75 : vector<2x1xf32> to vector<2x9xf32>
    %77 = arith.subf %69, %76 : vector<2x9xf32>
    %78 = math.exp %77 : vector<2x9xf32>
    %cst_23 = arith.constant dense<0.000000e+00> : vector<2x9xf32>
    %79 = tpu.matmul %78, %25, %cst_23 {dimension_numbers = #tpu.dot_dimension_numbers<[1], [0], [0], [1], [0, 0, 1, 1], [], []>} : vector<2x9xf32>, vector<9x9xf32>, vector<2x9xf32> -> vector<2x9xf32>
    %cst_24 = arith.constant 1.000000e-30 : f32
    %80 = vector.broadcast %cst_24 : f32 to vector<2x9xf32>
    %81 = arith.maximumf %79, %80 : vector<2x9xf32>
    %82 = math.log %81 : vector<2x9xf32>
    %83 = vector.broadcast %75 : vector<2x1xf32> to vector<2x9xf32>
    %84 = arith.addf %83, %82 : vector<2x9xf32>
    %85 = arith.addf %84, %70 : vector<2x9xf32>
    %86 = vector.shape_cast %73 : vector<2x1xi1> to vector<2x1xi1>
    %87 = vector.broadcast %86 : vector<2x1xi1> to vector<2x9xi1>
    %88 = arith.select %87, %85, %69 : vector<2x9xi1>, vector<2x9xf32>
    %89 = vector.extract_strided_slice %23 {offsets = [6, 0], sizes = [2, 9], strides = [1, 1]} : vector<16x9xf32> to vector<2x9xf32>
    %90 = vector.extract_strided_slice %5 {offsets = [6, 0], sizes = [2, 1], strides = [1, 1]} : vector<16x1xi32> to vector<2x1xi32>
    %c0_i32_25 = arith.constant 0 : i32
    %91 = vector.broadcast %c0_i32_25 : i32 to vector<2x1xi32>
    %92 = arith.cmpi sgt, %90, %91 : vector<2x1xi32>
    %cst_26 = arith.constant dense<0xFF800000> : vector<2xf32>
    %93 = vector.multi_reduction <maximumf>, %88, %cst_26 [1] : vector<2x9xf32> to vector<2xf32>
    %94 = vector.shape_cast %93 : vector<2xf32> to vector<2x1xf32>
    %95 = vector.broadcast %94 : vector<2x1xf32> to vector<2x9xf32>
    %96 = arith.subf %88, %95 : vector<2x9xf32>
    %97 = math.exp %96 : vector<2x9xf32>
    %cst_27 = arith.constant dense<0.000000e+00> : vector<2x9xf32>
    %98 = tpu.matmul %97, %25, %cst_27 {dimension_numbers = #tpu.dot_dimension_numbers<[1], [0], [0], [1], [0, 0, 1, 1], [], []>} : vector<2x9xf32>, vector<9x9xf32>, vector<2x9xf32> -> vector<2x9xf32>
    %cst_28 = arith.constant 1.000000e-30 : f32
    %99 = vector.broadcast %cst_28 : f32 to vector<2x9xf32>
    %100 = arith.maximumf %98, %99 : vector<2x9xf32>
    %101 = math.log %100 : vector<2x9xf32>
    %102 = vector.broadcast %94 : vector<2x1xf32> to vector<2x9xf32>
    %103 = arith.addf %102, %101 : vector<2x9xf32>
    %104 = arith.addf %103, %89 : vector<2x9xf32>
    %105 = vector.shape_cast %92 : vector<2x1xi1> to vector<2x1xi1>
    %106 = vector.broadcast %105 : vector<2x1xi1> to vector<2x9xi1>
    %107 = arith.select %106, %104, %88 : vector<2x9xi1>, vector<2x9xf32>
    %108 = vector.extract_strided_slice %23 {offsets = [8, 0], sizes = [2, 9], strides = [1, 1]} : vector<16x9xf32> to vector<2x9xf32>
    %109 = vector.extract_strided_slice %5 {offsets = [8, 0], sizes = [2, 1], strides = [1, 1]} : vector<16x1xi32> to vector<2x1xi32>
    %c0_i32_29 = arith.constant 0 : i32
    %110 = vector.broadcast %c0_i32_29 : i32 to vector<2x1xi32>
    %111 = arith.cmpi sgt, %109, %110 : vector<2x1xi32>
    %cst_30 = arith.constant dense<0xFF800000> : vector<2xf32>
    %112 = vector.multi_reduction <maximumf>, %107, %cst_30 [1] : vector<2x9xf32> to vector<2xf32>
    %113 = vector.shape_cast %112 : vector<2xf32> to vector<2x1xf32>
    %114 = vector.broadcast %113 : vector<2x1xf32> to vector<2x9xf32>
    %115 = arith.subf %107, %114 : vector<2x9xf32>
    %116 = math.exp %115 : vector<2x9xf32>
    %cst_31 = arith.constant dense<0.000000e+00> : vector<2x9xf32>
    %117 = tpu.matmul %116, %25, %cst_31 {dimension_numbers = #tpu.dot_dimension_numbers<[1], [0], [0], [1], [0, 0, 1, 1], [], []>} : vector<2x9xf32>, vector<9x9xf32>, vector<2x9xf32> -> vector<2x9xf32>
    %cst_32 = arith.constant 1.000000e-30 : f32
    %118 = vector.broadcast %cst_32 : f32 to vector<2x9xf32>
    %119 = arith.maximumf %117, %118 : vector<2x9xf32>
    %120 = math.log %119 : vector<2x9xf32>
    %121 = vector.broadcast %113 : vector<2x1xf32> to vector<2x9xf32>
    %122 = arith.addf %121, %120 : vector<2x9xf32>
    %123 = arith.addf %122, %108 : vector<2x9xf32>
    %124 = vector.shape_cast %111 : vector<2x1xi1> to vector<2x1xi1>
    %125 = vector.broadcast %124 : vector<2x1xi1> to vector<2x9xi1>
    %126 = arith.select %125, %123, %107 : vector<2x9xi1>, vector<2x9xf32>
    %127 = vector.extract_strided_slice %23 {offsets = [10, 0], sizes = [2, 9], strides = [1, 1]} : vector<16x9xf32> to vector<2x9xf32>
    %128 = vector.extract_strided_slice %5 {offsets = [10, 0], sizes = [2, 1], strides = [1, 1]} : vector<16x1xi32> to vector<2x1xi32>
    %c0_i32_33 = arith.constant 0 : i32
    %129 = vector.broadcast %c0_i32_33 : i32 to vector<2x1xi32>
    %130 = arith.cmpi sgt, %128, %129 : vector<2x1xi32>
    %cst_34 = arith.constant dense<0xFF800000> : vector<2xf32>
    %131 = vector.multi_reduction <maximumf>, %126, %cst_34 [1] : vector<2x9xf32> to vector<2xf32>
    %132 = vector.shape_cast %131 : vector<2xf32> to vector<2x1xf32>
    %133 = vector.broadcast %132 : vector<2x1xf32> to vector<2x9xf32>
    %134 = arith.subf %126, %133 : vector<2x9xf32>
    %135 = math.exp %134 : vector<2x9xf32>
    %cst_35 = arith.constant dense<0.000000e+00> : vector<2x9xf32>
    %136 = tpu.matmul %135, %25, %cst_35 {dimension_numbers = #tpu.dot_dimension_numbers<[1], [0], [0], [1], [0, 0, 1, 1], [], []>} : vector<2x9xf32>, vector<9x9xf32>, vector<2x9xf32> -> vector<2x9xf32>
    %cst_36 = arith.constant 1.000000e-30 : f32
    %137 = vector.broadcast %cst_36 : f32 to vector<2x9xf32>
    %138 = arith.maximumf %136, %137 : vector<2x9xf32>
    %139 = math.log %138 : vector<2x9xf32>
    %140 = vector.broadcast %132 : vector<2x1xf32> to vector<2x9xf32>
    %141 = arith.addf %140, %139 : vector<2x9xf32>
    %142 = arith.addf %141, %127 : vector<2x9xf32>
    %143 = vector.shape_cast %130 : vector<2x1xi1> to vector<2x1xi1>
    %144 = vector.broadcast %143 : vector<2x1xi1> to vector<2x9xi1>
    %145 = arith.select %144, %142, %126 : vector<2x9xi1>, vector<2x9xf32>
    %146 = vector.extract_strided_slice %23 {offsets = [12, 0], sizes = [2, 9], strides = [1, 1]} : vector<16x9xf32> to vector<2x9xf32>
    %147 = vector.extract_strided_slice %5 {offsets = [12, 0], sizes = [2, 1], strides = [1, 1]} : vector<16x1xi32> to vector<2x1xi32>
    %c0_i32_37 = arith.constant 0 : i32
    %148 = vector.broadcast %c0_i32_37 : i32 to vector<2x1xi32>
    %149 = arith.cmpi sgt, %147, %148 : vector<2x1xi32>
    %cst_38 = arith.constant dense<0xFF800000> : vector<2xf32>
    %150 = vector.multi_reduction <maximumf>, %145, %cst_38 [1] : vector<2x9xf32> to vector<2xf32>
    %151 = vector.shape_cast %150 : vector<2xf32> to vector<2x1xf32>
    %152 = vector.broadcast %151 : vector<2x1xf32> to vector<2x9xf32>
    %153 = arith.subf %145, %152 : vector<2x9xf32>
    %154 = math.exp %153 : vector<2x9xf32>
    %cst_39 = arith.constant dense<0.000000e+00> : vector<2x9xf32>
    %155 = tpu.matmul %154, %25, %cst_39 {dimension_numbers = #tpu.dot_dimension_numbers<[1], [0], [0], [1], [0, 0, 1, 1], [], []>} : vector<2x9xf32>, vector<9x9xf32>, vector<2x9xf32> -> vector<2x9xf32>
    %cst_40 = arith.constant 1.000000e-30 : f32
    %156 = vector.broadcast %cst_40 : f32 to vector<2x9xf32>
    %157 = arith.maximumf %155, %156 : vector<2x9xf32>
    %158 = math.log %157 : vector<2x9xf32>
    %159 = vector.broadcast %151 : vector<2x1xf32> to vector<2x9xf32>
    %160 = arith.addf %159, %158 : vector<2x9xf32>
    %161 = arith.addf %160, %146 : vector<2x9xf32>
    %162 = vector.shape_cast %149 : vector<2x1xi1> to vector<2x1xi1>
    %163 = vector.broadcast %162 : vector<2x1xi1> to vector<2x9xi1>
    %164 = arith.select %163, %161, %145 : vector<2x9xi1>, vector<2x9xf32>
    %165 = vector.extract_strided_slice %23 {offsets = [14, 0], sizes = [2, 9], strides = [1, 1]} : vector<16x9xf32> to vector<2x9xf32>
    %166 = vector.extract_strided_slice %5 {offsets = [14, 0], sizes = [2, 1], strides = [1, 1]} : vector<16x1xi32> to vector<2x1xi32>
    %c0_i32_41 = arith.constant 0 : i32
    %167 = vector.broadcast %c0_i32_41 : i32 to vector<2x1xi32>
    %168 = arith.cmpi sgt, %166, %167 : vector<2x1xi32>
    %cst_42 = arith.constant dense<0xFF800000> : vector<2xf32>
    %169 = vector.multi_reduction <maximumf>, %164, %cst_42 [1] : vector<2x9xf32> to vector<2xf32>
    %170 = vector.shape_cast %169 : vector<2xf32> to vector<2x1xf32>
    %171 = vector.broadcast %170 : vector<2x1xf32> to vector<2x9xf32>
    %172 = arith.subf %164, %171 : vector<2x9xf32>
    %173 = math.exp %172 : vector<2x9xf32>
    %cst_43 = arith.constant dense<0.000000e+00> : vector<2x9xf32>
    %174 = tpu.matmul %173, %25, %cst_43 {dimension_numbers = #tpu.dot_dimension_numbers<[1], [0], [0], [1], [0, 0, 1, 1], [], []>} : vector<2x9xf32>, vector<9x9xf32>, vector<2x9xf32> -> vector<2x9xf32>
    %cst_44 = arith.constant 1.000000e-30 : f32
    %175 = vector.broadcast %cst_44 : f32 to vector<2x9xf32>
    %176 = arith.maximumf %174, %175 : vector<2x9xf32>
    %177 = math.log %176 : vector<2x9xf32>
    %178 = vector.broadcast %170 : vector<2x1xf32> to vector<2x9xf32>
    %179 = arith.addf %178, %177 : vector<2x9xf32>
    %180 = arith.addf %179, %165 : vector<2x9xf32>
    %181 = vector.shape_cast %168 : vector<2x1xi1> to vector<2x1xi1>
    %182 = vector.broadcast %181 : vector<2x1xi1> to vector<2x9xi1>
    %183 = arith.select %182, %180, %164 : vector<2x9xi1>, vector<2x9xf32>
    %184 = vector.extract_strided_slice %11 {offsets = [8, 0], sizes = [1, 9], strides = [1, 1]} : vector<9x9xf32> to vector<1x9xf32>
    %185 = vector.broadcast %184 : vector<1x9xf32> to vector<2x9xf32>
    %186 = arith.addf %183, %185 : vector<2x9xf32>
    %cst_45 = arith.constant dense<0xFF800000> : vector<2xf32>
    %187 = vector.multi_reduction <maximumf>, %186, %cst_45 [1] : vector<2x9xf32> to vector<2xf32>
    %188 = vector.shape_cast %187 : vector<2xf32> to vector<2x1xf32>
    %189 = vector.broadcast %188 : vector<2x1xf32> to vector<2x9xf32>
    %190 = arith.subf %186, %189 : vector<2x9xf32>
    %191 = math.exp %190 : vector<2x9xf32>
    %cst_46 = arith.constant dense<0.000000e+00> : vector<2xf32>
    %192 = vector.multi_reduction <add>, %191, %cst_46 [1] : vector<2x9xf32> to vector<2xf32>
    %193 = vector.shape_cast %192 : vector<2xf32> to vector<2x1xf32>
    %194 = math.log %193 : vector<2x1xf32>
    %195 = arith.addf %188, %194 : vector<2x1xf32>
    %196 = arith.sitofp %5 : vector<16x1xi32> to vector<16x1xf32>
    %197 = arith.sitofp %6 : vector<16x1xi32> to vector<16x1xf32>
    %198 = vector.broadcast %3 : vector<16x1xi32> to vector<16x9xi32>
    %199 = arith.cmpi eq, %19, %198 : vector<16x9xi32>
    %200 = arith.extui %199 : vector<16x9xi1> to vector<16x9xi32>
    %201 = arith.sitofp %200 : vector<16x9xi32> to vector<16x9xf32>
    %202 = vector.broadcast %4 : vector<16x1xi32> to vector<16x9xi32>
    %203 = arith.cmpi eq, %19, %202 : vector<16x9xi32>
    %204 = arith.extui %203 : vector<16x9xi1> to vector<16x9xi32>
    %205 = arith.sitofp %204 : vector<16x9xi32> to vector<16x9xf32>
    %206 = arith.mulf %23, %201 : vector<16x9xf32>
    %cst_47 = arith.constant dense<0.000000e+00> : vector<16xf32>
    %207 = vector.multi_reduction <add>, %206, %cst_47 [1] : vector<16x9xf32> to vector<16xf32>
    %208 = vector.shape_cast %207 : vector<16xf32> to vector<16x1xf32>
    %209 = arith.mulf %208, %196 : vector<16x1xf32>
    %cst_48 = arith.constant dense<0.000000e+00> : vector<16x9xf32>
    %210 = tpu.matmul %201, %11, %cst_48 {dimension_numbers = #tpu.dot_dimension_numbers<[1], [0], [0], [1], [0, 0, 1, 1], [], []>} : vector<16x9xf32>, vector<9x9xf32>, vector<16x9xf32> -> vector<16x9xf32>
    %211 = arith.mulf %210, %205 : vector<16x9xf32>
    %cst_49 = arith.constant dense<0.000000e+00> : vector<16xf32>
    %212 = vector.multi_reduction <add>, %211, %cst_49 [1] : vector<16x9xf32> to vector<16xf32>
    %213 = vector.shape_cast %212 : vector<16xf32> to vector<16x1xf32>
    %214 = arith.mulf %213, %197 : vector<16x1xf32>
    %215 = arith.addf %209, %214 : vector<16x1xf32>
    %216 = tpu.iota {dimensions = array<i32: 1>} : vector<16x2xi32>
    %217 = vector.broadcast %7 : vector<16x1xi32> to vector<16x2xi32>
    %218 = arith.cmpi eq, %216, %217 : vector<16x2xi32>
    %219 = arith.extui %218 : vector<16x2xi1> to vector<16x2xi32>
    %220 = arith.sitofp %219 : vector<16x2xi32> to vector<16x2xf32>
    %221 = vector.broadcast %215 : vector<16x1xf32> to vector<16x2xf32>
    %222 = arith.mulf %221, %220 : vector<16x2xf32>
    %cst_50 = arith.constant dense<0.000000e+00> : vector<2xf32>
    %223 = vector.multi_reduction <add>, %222, %cst_50 [0] : vector<16x2xf32> to vector<2xf32>
    %224 = vector.shape_cast %223 : vector<2xf32> to vector<1x2xf32>
    %225 = vector.extract_strided_slice %196 {offsets = [14, 0], sizes = [2, 1], strides = [1, 1]} : vector<16x1xf32> to vector<2x1xf32>
    %226 = vector.extract_strided_slice %11 {offsets = [8, 0], sizes = [1, 9], strides = [1, 1]} : vector<9x9xf32> to vector<1x9xf32>
    %227 = vector.extract_strided_slice %201 {offsets = [14, 0], sizes = [2, 9], strides = [1, 1]} : vector<16x9xf32> to vector<2x9xf32>
    %228 = vector.broadcast %226 : vector<1x9xf32> to vector<2x9xf32>
    %229 = arith.mulf %228, %227 : vector<2x9xf32>
    %cst_51 = arith.constant dense<0.000000e+00> : vector<2xf32>
    %230 = vector.multi_reduction <add>, %229, %cst_51 [1] : vector<2x9xf32> to vector<2xf32>
    %231 = vector.shape_cast %230 : vector<2xf32> to vector<2x1xf32>
    %232 = arith.mulf %225, %231 : vector<2x1xf32>
    %233 = arith.subf %232, %195 : vector<2x1xf32>
    %234 = tpu.iota {dimensions = array<i32: 0>} : vector<2x2xi32>
    %235 = tpu.iota {dimensions = array<i32: 1>} : vector<2x2xi32>
    %236 = arith.cmpi eq, %234, %235 : vector<2x2xi32>
    %237 = arith.extui %236 : vector<2x2xi1> to vector<2x2xi32>
    %238 = arith.sitofp %237 : vector<2x2xi32> to vector<2x2xf32>
    %239 = vector.broadcast %233 : vector<2x1xf32> to vector<2x2xf32>
    %240 = arith.mulf %239, %238 : vector<2x2xf32>
    %cst_52 = arith.constant dense<0.000000e+00> : vector<2xf32>
    %241 = vector.multi_reduction <add>, %240, %cst_52 [0] : vector<2x2xf32> to vector<2xf32>
    %242 = vector.shape_cast %241 : vector<2xf32> to vector<1x2xf32>
    %243 = arith.addf %224, %242 : vector<1x2xf32>
    %c0_53 = arith.constant 0 : index
    %c0_54 = arith.constant 0 : index
    %c0_55 = arith.constant 0 : index
    %244 = vector.load %arg5[%c0_53, %c0_54, %c0_55] : memref<1x1x2xf32, #tpu.memory_space<vmem>>, vector<1x1x2xf32>
    %245 = vector.shape_cast %244 : vector<1x1x2xf32> to vector<1x2xf32>
    %246 = vector.shape_cast %243 : vector<1x2xf32> to vector<1x1x2xf32>
    tpu.vector_store %arg5[%c0_53, %c0_54, %c0_55], %246 {strides = array<i32>} : memref<1x1x2xf32, #tpu.memory_space<vmem>>, vector<1x1x2xf32>,
    return
  }
  func.func @transform_0(%arg0: i32) -> (i32, i32, i32) {
    %c0_i32 = arith.constant 0 : i32
    %c0_i32_0 = arith.constant 0 : i32
    %c0_i32_1 = arith.constant 0 : i32
    return %arg0, %c0_i32, %c0_i32_0 : i32, i32, i32
  }
  func.func @transform_1(%arg0: i32) -> (i32, i32, i32) {
    %c0_i32 = arith.constant 0 : i32
    %c0_i32_0 = arith.constant 0 : i32
    %c0_i32_1 = arith.constant 0 : i32
    return %arg0, %c0_i32, %c0_i32_0 : i32, i32, i32
  }
  func.func @transform_2(%arg0: i32) -> (i32, i32) {
    %c0_i32 = arith.constant 0 : i32
    %c0_i32_0 = arith.constant 0 : i32
    %c0_i32_1 = arith.constant 0 : i32
    return %c0_i32, %c0_i32_0 : i32, i32
  }
  func.func @transform_3(%arg0: i32) -> (i32, i32) {
    %c0_i32 = arith.constant 0 : i32
    %c0_i32_0 = arith.constant 0 : i32
    %c0_i32_1 = arith.constant 0 : i32
    return %c0_i32, %c0_i32_0 : i32, i32
  }
  func.func @transform_4(%arg0: i32) -> (i32, i32, i32) {
    %c0_i32 = arith.constant 0 : i32
    %c0_i32_0 = arith.constant 0 : i32
    %c0_i32_1 = arith.constant 0 : i32
    return %arg0, %c0_i32, %c0_i32_0 : i32, i32, i32
  }
}

</mosaic_0001>

<bundles_post_ra>
// kernel: tpu_custom_call.1
= control target key start
LH: loop header
LB: loop body
LE: loop exit
PB: predicated region body
PF: predicated region fallthrough
CT: control target
= control target key end

     0   :  { %v65_v2 = vlaneseq  ;;  %v810_v5 = vmov 0   ;;  %v811_v6 = vmov 3   ;;  %vm119_vm0 = vcmask 72704   ;;  %s1034_s0 = inlined_call_operand.vmem [shape: s32[1,16,6], index: 0, kind: input, shape index: {}]   ;;  %s1035_s1 = inlined_call_operand.vmem [shape: f32[1,24,32], index: 1, kind: input, shape index: {}]   ;;  %s1036_s2 = inlined_call_operand.vmem [shape: f32[32,9], index: 2, kind: input, shape index: {}]   ;;  %s1037_s3 = inlined_call_operand.vmem [shape: f32[9,9], index: 3, kind: input, shape index: {}]   ;;  %s1038_s4 = inlined_call_operand.hbm [shape: f32[1,1,2], index: 4, kind: output, shape index: {}]  }
   0x1   :  { %v26_v0 = vld [vmem:[%s1036_s2 + $0x18] sm:$0xff]  ;;  %v25_v1 = vld [vmem:[%s1036_s2 + $0x10] sm:$0xff]  ;;  %v24_v3 = vld [vmem:[%s1036_s2 + $0x8] sm:$0xff]  ;;  %730 = vset.pattern.permute.xlu0 %v810_v5  ;;  %731 = vset.pattern.permute.xlu1 %v811_v6 }
   0x2   :  { %51 = vmatpush.msra.mxu0 %v26_v0  ;;  %717 = vmatpush.msra.mxu2 %v26_v0  ;;  %v854_v4 = vand.u32 127, %v65_v2 }
   0x4   :  { %52 = vmatpush.msra.mxu0 %v25_v1  ;;  %718 = vmatpush.msra.mxu2 %v25_v1 }
   0x5   :  { %9 = vsyncpa [#allocation3], 0  ;;  %vm116_vm1 = vcmp.eq.s32.totalorder %v854_v4, 7  ;;  %v23_v7 = vld [vmem:[%s1036_s2] sm:$0xff]  ;;  %732 = vset.pattern.permute.xlu2 %v810_v5  ;;  %v812_v8 = vmov -100.0   ;;  %vm29_vm2 = vcmask 261120  }
   0x6   :  { %53 = vmatpush.msra.mxu0 %v24_v3  ;;  %719 = vmatpush.msra.mxu2 %v24_v3  ;;  %v861_v9 = vsel %vm116_vm1, 0.0, %v812_v8  ;;  %v20_v10 = vld [vmem:[%s1035_s1] sm:$0xff]  ;;  %v22_v12 = vld [vmem:[%s1035_s1 + $0x10] sm:$0xff]  ;;  %v21_v13 = vld [vmem:[%s1035_s1 + $0x8] sm:$0xff]  ;;  %v813_v17 = vmov 1   ;;  %vm545_vm4 = vcmask 1040384  }
   0x7   :  { %v120_v11 = vsel %vm119_vm0, %v861_v9, -inf  ;;  %v877_v14 = vld [vmem:[%s1034_s0] sm:$0xff]  ;;  %v883_v15 = vld [vmem:[%s1034_s0 + $0x8] sm:$0xff]  ;;  %v814_v28 = vmov 2   ;;  %v815_v34 = vmov 0.0   ;;  %vm79_vm7 = vcmask 195584  }
   0x8   :  { %121 = vmax.xlane.f32.xlu0 %v120_v11  ;;  %54 = vmatpush.msra.mxu0 %v23_v7  ;;  %vm303_vm3 = vcmp.gt.s32.totalorder %v883_v15, 0  ;;  %v28_v18 = vld [vmem:[%s1037_s3 + $0x8] sm:$0x1]  ;;  %v27_v20 = vld [vmem:[%s1037_s3] sm:$0xff]  ;;  %vm118_vm5 = vcmp.gt.s32.totalorder %v877_v14, 0  ;;  %vm109_vm9 = vcmp.ge.s32.totalorder %v854_v4, 7 }
   0x9   :  { %720 = vmatpush.msra.mxu2 %v23_v7  ;;  %676 = vmatmul.msk.f32.vlgmr.msra.gmra.mxu0 %vm29_vm2, %v20_v10  ;;  %v346_v16 = vsel %vm303_vm3, 1, %v810_v5  ;;  %v114_v19 = vmul.f32 1.442695, %v28_v18  ;;  %v112_v21 = vmul.f32 1.442695, %v27_v20  ;;  %v160_v27 = vsel %vm118_vm5, 1, %v810_v5 }
   0xa   :  { %678 = vmatmul.msk.f32.vlgmr.msra.gmra.mxu2 %vm29_vm2, %v22_v12  ;;  %711 = vmatpush.msk.msrb.mxu0 %vm545_vm4, %v28_v18  ;;  %vm166_vm11 = vcmask 66560   ;;  %vm211_vm13 = vcmask 68610   ;;  %vm257_vm14 = vcmask 70660   ;;  %vm304_vm15 = vcmask 72710   ;;  %s818_s10 = smov [#allocation2]   ;;  %s667_s14 = sshll.u32 %s1038_s4, 4  ;;  %s668_s14 = int_to_ptr.hbm [resolvable:$true] %s667_s14 }
   0xb   :  { %744 = vpow2.f32 %v114_v19  ;;  %162 = vperm.xlu1 %731, %v160_v27   ;;  %s665_s11 = sshll.u32 %s818_s10, 4  ;;  %s666_s11 = int_to_ptr.vmem [resolvable:$true] %s665_s11 }
   0xc   :  { %746 = vpow2.f32 %v112_v21  ;;  %564 = vmatpush.msrb.mxu0 %v27_v20 }
  0x11   :  { %677 = vmatmul.msk.f32.gmra.mxu0 %vm29_vm2, %v21_v13  ;;  %v894_v22 = vpop.eup %744 }
  0x12   :  { %683 = vmatpush.xpose.msk.msrb.mxu2 %vm119_vm0, %v894_v22  ;;  %686 = vmatpush.xpose.msk.msra.mxu3 %vm119_vm0, %v894_v22  ;;  %v900_v23 = vpop.eup %746 }
  0x13   :  { %735 = vset.pattern.permute.xlu1 %v813_v17 }
  0x16   :  { %684 = vmatpush.xpose.msk.msrb.mxu2 %vm119_vm0, %v900_v23  ;;  %687 = vmatpush.xpose.msk.msra.mxu3 %vm119_vm0, %v900_v23 }
  0x1a   :  { %689 = vmatpush.xpose.msk.msra.mxu2 %vm119_vm0, %v894_v22  ;;  %692 = vmatpush.xpose.msk.msrb.mxu3 %vm119_vm0, %v894_v22 }
  0x1c   :  { %68 = vperm.xlu0 %730, %v877_v14  }
  0x1e   :  { %690 = vmatpush.xpose.msk.msra.mxu2 %vm119_vm0, %v900_v23  ;;  %693 = vmatpush.xpose.msk.msrb.mxu3 %vm119_vm0, %v900_v23 }
  0x24   :  { %733 = vset.pattern.permute.xlu0 %v811_v6 }
  0x25   :  { %348 = vperm.xlu0 %733, %v346_v16  }
  0x2d   :  { %734 = vset.pattern.permute.xlu0 %v813_v17 }
  0x2e   :  { %506 = vperm.xlu0 %734, %v877_v14  }
  0x36   :  { %736 = vset.pattern.permute.xlu0 %v814_v28 }
  0x37   :  { %518 = vperm.xlu0 %736, %v877_v14  }
  0x7b   :  { %v122_v24 = vpop.xlane.xlu0 %121 }
  0x7c   :  { %v123_v25 = vsub.f32 %v861_v9, %v122_v24 }
  0x7d   :  { %v940_v44 = vpop.permute.xlu1 %162 }
  0x7e   :  { %v124_v26 = vmul.f32 1.442695, %v123_v25  ;;  %vm164_vm10 = vcmp.eq.s32.totalorder %v940_v44, 1 }
  0x80   :  { %748 = vpow2.f32 %v124_v26 }
  0x86   :  { %v749_v29 = vpop.eup %748  ;;  %v56_v30 = vpop.f32.mrf.mxu0 }
  0x87   :  { %685 = vmatmul.msk.f32.vlgmr.msrb.gmra.mxu2 %vm119_vm0, %v749_v29 }
  0x88   :  { %698 = vmatpush.xpose.msk.msrb.mxu2 %vm119_vm0, %v894_v22 }
  0x8c   :  { %699 = vmatpush.xpose.msk.msrb.mxu2 %vm119_vm0, %v900_v23 }
  0x8d   :  { %v62_v31 = vpop.f32.mrf.mxu2 }
  0x8e   :  { %99 = vmatpush.msra.mxu1 %v62_v31  ;;  %v59_v32 = vpop.f32.mrf.mxu0  ;;  %v69_v33 = vpop.permute.xlu0 %68 }
  0x8f   :  { %vm73_vm6 = vcmp.eq.s32.totalorder %v854_v4, %v69_v33 }
  0x90   :  { %100 = vmatpush.msra.mxu1 %v59_v32  ;;  %v679_v35 = vsel %vm73_vm6, 1.0, %v815_v34 }
  0x92   :  { %101 = vmatpush.msra.mxu1 %v56_v30 }
  0x93   :  { %681 = vmatmul.msk.f32.vlgmr.msra.gmra.mxu1 %vm79_vm7, %v679_v35 }
  0x94   :  { %695 = vmatpush.xpose.msk.msrb.mxu1 %vm119_vm0, %v894_v22 }
  0x97   :  { %v928_v36 = vpop.permute.xlu0 %348 }
  0x98   :  { %696 = vmatpush.xpose.msk.msrb.mxu1 %vm119_vm0, %v900_v23  ;;  %vm350_vm2 = vcmp.eq.s32.totalorder %v928_v36, 1  ;;  %v817_v36 = vmov 5  }
  0x99   :  { %739 = vset.pattern.permute.xlu0 %v817_v36 }
  0x9c   :  { %704 = vmatpush.xpose.msk.msra.mxu1 %vm119_vm0, %v894_v22 }
  0xa0   :  { %705 = vmatpush.xpose.msk.msra.mxu1 %vm119_vm0, %v900_v23  ;;  %v507_v37 = vpop.permute.xlu0 %506 }
  0xa1   :  { %vm511_vm8 = vcmp.eq.s32.totalorder %v854_v4, %v507_v37 }
  0xa2   :  { %v707_v38 = vsel %vm511_vm8, 1.0, %v815_v34  ;;  %vm649_vm8 = vcmask 9216  }
  0xa3   :  { %712 = vmatmul.msk.f32.vlgmr.msrb.gmra.mxu0 %vm119_vm0, %v707_v38 }
  0xa9   :  { %v519_v48 = vpop.permute.xlu0 %518 }
  0xaa   :  { %vm523_vm12 = vcmp.eq.s32.totalorder %v854_v4, %v519_v48 }
  0xab   :  { %v709_v51 = vsel %vm523_vm12, 1.0, %v815_v34 }
 0x10a   :  { %v152_v39 = vpop.f32.mrf.mxu2 }
 0x10b   :  { %v155_v40 = vmax.f32 %v152_v39, 1e-30 }
 0x10d   :  { %750 = vlog2.f32 %v155_v40 }
 0x110   :  { %v103_v41 = vpop.f32.mrf.mxu1 }
 0x111   :  { %v110_v45 = vsel %vm109_vm9, -100.0, %v103_v41 }
 0x112   :  { %v529_v55 = vmul.f32 %v707_v38, %v110_v45  ;;  %v201_v1 = vrot.slane %v110_v45, 2 }
 0x113   :  { %v751_v42 = vpop.eup %750 }
 0x114   :  { %v157_v43 = vmul.f32 0.6931472, %v751_v42  ;;  %v531_v56 = vsel %vm119_vm0, %v529_v55, 0.0 }
 0x116   :  { %v158_v46 = vadd.f32 %v157_v43, %v122_v24 }
 0x118   :  { %v159_v47 = vadd.f32 %v158_v46, %v110_v45 }
 0x11a   :  { %v165_v49 = vsel %vm164_vm10, %v159_v47, %v861_v9 }
 0x11b   :  { %v167_v50 = vsel %vm166_vm11, %v165_v49, -inf  ;;  %v208_v7 = vrot.slane %v165_v49, 6 }
 0x11c   :  { %168 = vmax.xlane.f32.xlu1 %v167_v50 }
 0x120   :  { %v566_v52 = vpop.f32.mrf.mxu0 }
 0x121   :  { %v572_v53 = vmul.f32 %v709_v51, %v566_v52 }
 0x123   :  { %v574_v54 = vsel %vm119_vm0, %v572_v53, 0.0 }
 0x124   :  { %575 = vadd.xlane.f32.xlu0 %v574_v54 }
 0x12c   :  { %532 = vadd.xlane.f32.xlu0 %v531_v56 }
 0x18f   :  { %v169_v57 = vpop.xlane.xlu1 %168 }
 0x190   :  { %v170_v58 = vsub.f32 %v165_v49, %v169_v57 }
 0x192   :  { %v171_v59 = vmul.f32 1.442695, %v170_v58 }
 0x194   :  { %752 = vpow2.f32 %v171_v59 }
 0x19a   :  { %v753_v60 = vpop.eup %752 }
 0x19b   :  { %688 = vmatmul.msk.f32.vlgmr.msra.gmra.mxu3 %vm119_vm0, %v753_v60 }
 0x19c   :  { %701 = vmatpush.xpose.msk.msra.mxu3 %vm119_vm0, %v894_v22 }
 0x1a0   :  { %702 = vmatpush.xpose.msk.msra.mxu3 %vm119_vm0, %v900_v23 }
 0x21e   :  { %v193_v61 = vpop.f32.mrf.mxu3 }
 0x21f   :  { %v196_v62 = vmax.f32 %v193_v61, 1e-30 }
 0x221   :  { %754 = vlog2.f32 %v196_v62 }
 0x227   :  { %v755_v63 = vpop.eup %754 }
 0x228   :  { %v198_v0 = vmul.f32 0.6931472, %v755_v63 }
 0x22a   :  { %v199_v3 = vadd.f32 %v198_v0, %v169_v57 }
 0x22c   :  { %v203_v5 = vadd.f32 %v201_v1, %v199_v3 }
 0x22e   :  { %v205_v8 = vrot.slane %v203_v5, 6 }
 0x230   :  { %v210_v9 = vsel %vm164_vm10, %v205_v8, %v208_v7 }
 0x231   :  { %v212_v10 = vsel %vm211_vm13, %v210_v9, -inf  ;;  %v254_v25 = vrot.slane %v210_v9, 6 }
 0x232   :  { %213 = vmax.xlane.f32.xlu2 %v212_v10 }
 0x2a5   :  { %v214_v11 = vpop.xlane.xlu2 %213 }
 0x2a6   :  { %v215_v12 = vsub.f32 %v210_v9, %v214_v11 }
 0x2a8   :  { %v216_v13 = vmul.f32 1.442695, %v215_v12 }
 0x2aa   :  { %756 = vpow2.f32 %v216_v13 }
 0x2b0   :  { %v757_v16 = vpop.eup %756 }
 0x2b1   :  { %v219_v17 = vrot.slane %v757_v16, 2 }
 0x2b3   :  { %691 = vmatmul.msk.f32.vlgmr.msra.gmra.mxu2 %vm119_vm0, %v219_v17 }
 0x336   :  { %v239_v18 = vpop.f32.mrf.mxu2 }
 0x337   :  { %v242_v19 = vmax.f32 %v239_v18, 1e-30 }
 0x339   :  { %758 = vlog2.f32 %v242_v19 }
 0x33f   :  { %v759_v20 = vpop.eup %758 }
 0x340   :  { %v244_v21 = vmul.f32 0.6931472, %v759_v20 }
 0x342   :  { %v246_v22 = vrot.slane %v244_v21, 6 }
 0x344   :  { %v248_v23 = vadd.f32 %v246_v22, %v214_v11 }
 0x346   :  { %v249_v24 = vadd.f32 %v248_v23, %v201_v1 }
 0x348   :  { %v251_v26 = vrot.slane %v249_v24, 6 }
 0x34a   :  { %v256_v27 = vsel %vm164_vm10, %v251_v26, %v254_v25 }
 0x34b   :  { %v258_v29 = vsel %vm257_vm14, %v256_v27, -inf  ;;  %v300_v45 = vrot.slane %v256_v27, 6 }
 0x34c   :  { %259 = vmax.xlane.f32.xlu2 %v258_v29 }
 0x3bf   :  { %v260_v30 = vpop.xlane.xlu2 %259 }
 0x3c0   :  { %v261_v31 = vsub.f32 %v256_v27, %v260_v30 }
 0x3c2   :  { %v262_v32 = vmul.f32 1.442695, %v261_v31 }
 0x3c4   :  { %760 = vpow2.f32 %v262_v32 }
 0x3ca   :  { %v761_v33 = vpop.eup %760 }
 0x3cb   :  { %v265_v35 = vrot.slane %v761_v33, 4 }
 0x3cd   :  { %694 = vmatmul.msk.f32.vlgmr.msrb.gmra.mxu3 %vm119_vm0, %v265_v35 }
 0x450   :  { %v285_v37 = vpop.f32.mrf.mxu3 }
 0x451   :  { %v288_v38 = vmax.f32 %v285_v37, 1e-30 }
 0x453   :  { %762 = vlog2.f32 %v288_v38 }
 0x459   :  { %v763_v39 = vpop.eup %762 }
 0x45a   :  { %v290_v40 = vmul.f32 0.6931472, %v763_v39 }
 0x45c   :  { %v292_v41 = vrot.slane %v290_v40, 4 }
 0x45e   :  { %v294_v42 = vadd.f32 %v292_v41, %v260_v30 }
 0x460   :  { %v295_v43 = vadd.f32 %v294_v42, %v201_v1 }
 0x462   :  { %v297_v46 = vrot.slane %v295_v43, 6 }
 0x464   :  { %v302_v47 = vsel %vm164_vm10, %v297_v46, %v300_v45 }
 0x465   :  { %v305_v48 = vsel %vm304_vm15, %v302_v47, -inf  ;;  %v355_v0 = vrot.slane %v302_v47, 6 }
 0x466   :  { %306 = vmax.xlane.f32.xlu2 %v305_v48  ;;  %v743_v48 = vld [vmem:[%s1037_s3 + $0x8] ss:$0 sm:$0xff]  ;;  %s816_s3 = smov 127  }
 0x47e   :  { %71 = vperm.xlu2 %732, %v883_v15  }
 0x486   :  { %737 = vset.pattern.permute.xlu2 %v814_v28 }
 0x4d9   :  { %v307_v49 = vpop.xlane.xlu2 %306 }
 0x4da   :  { %v308_v50 = vsub.f32 %v302_v47, %v307_v49 }
 0x4dc   :  { %v309_v51 = vmul.f32 1.442695, %v308_v50 }
 0x4de   :  { %764 = vpow2.f32 %v309_v51 }
 0x4e1   :  { %v72_v52 = vpop.permute.xlu2 %71 }
 0x4e2   :  { %vm74_vm1 = vcmp.eq.s32.totalorder %v854_v4, %v72_v52 }
 0x4e3   :  { %v680_v53 = vsel %vm74_vm1, 1.0, %v815_v34 }
 0x4e4   :  { %682 = vmatmul.msk.f32.gmra.mxu1 %vm79_vm7, %v680_v53  ;;  %v765_v44 = vpop.eup %764  ;;  %vm616_vm7 = vcmask 15360  }
 0x4e5   :  { %v312_v54 = vrot.slane %v765_v44, 6 }
 0x4ec   :  { %697 = vmatmul.msk.f32.vlgmr.msrb.gmra.mxu1 %vm119_vm0, %v312_v54 }
 0x561   :  { %v106_v55 = vpop.f32.mrf.mxu1 }
 0x562   :  { %v977_v59 = vsel %vm109_vm9, -100.0, %v106_v55  ;;  %vm658_vm9 = vcmask 8192  }
 0x563   :  { %v980_v61 = vrot.slane %v977_v59, 2 }
 0x569   :  { %v332_v56 = vpop.f32.mrf.mxu1 }
 0x56a   :  { %v335_v57 = vmax.f32 %v332_v56, 1e-30 }
 0x56c   :  { %766 = vlog2.f32 %v335_v57 }
 0x572   :  { %v767_v28 = vpop.eup %766 }
 0x573   :  { %v337_v58 = vmul.f32 0.6931472, %v767_v28 }
 0x575   :  { %v339_v60 = vrot.slane %v337_v58, 2 }
 0x577   :  { %v341_v62 = vadd.f32 %v339_v60, %v307_v49 }
 0x579   :  { %v345_v63 = vadd.f32 %v980_v61, %v341_v62 }
 0x57b   :  { %v352_v1 = vrot.slane %v345_v63, 6 }
 0x57d   :  { %v357_v3 = vsel %vm350_vm2, %v352_v1, %v355_v0 }
 0x57e   :  { %v358_v5 = vsel %vm166_vm11, %v357_v3, -inf  ;;  %v396_v19 = vrot.slane %v357_v3, 6 }
 0x57f   :  { %359 = vmax.xlane.f32.xlu2 %v358_v5 }
 0x597   :  { %521 = vperm.xlu2 %737, %v883_v15  }
 0x59f   :  { %738 = vset.pattern.permute.xlu2 %v817_v36 }
 0x5f2   :  { %v360_v7 = vpop.xlane.xlu2 %359 }
 0x5f3   :  { %v361_v8 = vsub.f32 %v357_v3, %v360_v7 }
 0x5f5   :  { %v362_v9 = vmul.f32 1.442695, %v361_v8 }
 0x5f7   :  { %768 = vpow2.f32 %v362_v9 }
 0x5fa   :  { %v522_v54 = vpop.permute.xlu2 %521 }
 0x5fb   :  { %vm524_vm4 = vcmp.eq.s32.totalorder %v854_v4, %v522_v54 }
 0x5fc   :  { %v710_v57 = vsel %vm524_vm4, 1.0, %v815_v34 }
 0x5fd   :  { %v769_v10 = vpop.eup %768 }
 0x5fe   :  { %700 = vmatmul.msk.f32.vlgmr.msrb.gmra.mxu2 %vm119_vm0, %v769_v10 }
 0x681   :  { %v384_v11 = vpop.f32.mrf.mxu2 }
 0x682   :  { %v387_v12 = vmax.f32 %v384_v11, 1e-30  ;;  %v504_v11 = vcvt.s32.f32 %v883_v15 }
 0x684   :  { %770 = vlog2.f32 %v387_v12 }
 0x68a   :  { %v771_v13 = vpop.eup %770 }
 0x68b   :  { %v389_v16 = vmul.f32 0.6931472, %v771_v13 }
 0x68d   :  { %v390_v17 = vadd.f32 %v389_v16, %v360_v7 }
 0x68f   :  { %v391_v18 = vadd.f32 %v390_v17, %v980_v61 }
 0x691   :  { %v393_v20 = vrot.slane %v391_v18, 6 }
 0x693   :  { %v398_v21 = vsel %vm350_vm2, %v393_v20, %v396_v19  ;;  %v503_v19 = vcvt.s32.f32 %v877_v14  ;;  %v576_v20 = vpop.xlane.xlu0 %575 }
 0x694   :  { %v399_v22 = vsel %vm211_vm13, %v398_v21, -inf  ;;  %v441_v38 = vrot.slane %v398_v21, 6 }
 0x695   :  { %400 = vmax.xlane.f32.xlu1 %v399_v22 }
 0x69b   :  { %v533_v22 = vpop.xlane.xlu0 %532 }
 0x708   :  { %v401_v23 = vpop.xlane.xlu1 %400 }
 0x709   :  { %v402_v24 = vsub.f32 %v398_v21, %v401_v23  ;;  %v580_v21 = vmul.f32 %v576_v20, %v503_v19 }
 0x70b   :  { %v403_v25 = vmul.f32 1.442695, %v402_v24 }
 0x70d   :  { %772 = vpow2.f32 %v403_v25 }
 0x713   :  { %v773_v26 = vpop.eup %772 }
 0x714   :  { %v406_v27 = vrot.slane %v773_v26, 2 }
 0x716   :  { %703 = vmatmul.msk.f32.vlgmr.msra.gmra.mxu3 %vm119_vm0, %v406_v27 }
 0x799   :  { %v426_v29 = vpop.f32.mrf.mxu3 }
 0x79a   :  { %v429_v30 = vmax.f32 %v426_v29, 1e-30 }
 0x79c   :  { %774 = vlog2.f32 %v429_v30  ;;  %v537_v30 = vmul.f32 %v533_v22, %v503_v19 }
 0x7a2   :  { %v775_v31 = vpop.eup %774 }
 0x7a3   :  { %v431_v32 = vmul.f32 0.6931472, %v775_v31 }
 0x7a5   :  { %v433_v33 = vrot.slane %v431_v32, 6 }
 0x7a7   :  { %v435_v35 = vadd.f32 %v433_v33, %v401_v23 }
 0x7a9   :  { %v436_v37 = vadd.f32 %v435_v35, %v980_v61 }
 0x7ab   :  { %v438_v39 = vrot.slane %v436_v37, 6 }
 0x7ad   :  { %v443_v40 = vsel %vm350_vm2, %v438_v39, %v441_v38  ;;  %v633_v39 = vshrl.u32 %v65_v2, 7 }
 0x7ae   :  { %v444_v41 = vsel %vm257_vm14, %v443_v40, -inf  ;;  %v486_v1 = vrot.slane %v443_v40, 6 }
 0x7af   :  { %445 = vmax.xlane.f32.xlu1 %v444_v41  ;;  %vm634_vm6 = vcmp.eq.s32.totalorder %v633_v39, %v854_v4 }
 0x7c8   :  { %509 = vperm.xlu1 %735, %v883_v15  }
 0x7d0   :  { %740 = vset.pattern.permute.xlu1 %v811_v6 }
 0x822   :  { %v446_v42 = vpop.xlane.xlu1 %445 }
 0x823   :  { %v447_v43 = vsub.f32 %v443_v40, %v446_v42 }
 0x825   :  { %v448_v45 = vmul.f32 1.442695, %v447_v43 }
 0x827   :  { %776 = vpow2.f32 %v448_v45 }
 0x82d   :  { %v777_v46 = vpop.eup %776 }
 0x82e   :  { %v451_v47 = vrot.slane %v777_v46, 4 }
 0x830   :  { %706 = vmatmul.msk.f32.vlgmr.msra.gmra.mxu1 %vm119_vm0, %v451_v47  ;;  %v716_v47 = vsel %vm634_vm6, 1.0, %v815_v34 }
 0x83a   :  { %v510_v49 = vpop.permute.xlu1 %509 }
 0x83b   :  { %vm512_vm3 = vcmp.eq.s32.totalorder %v854_v4, %v510_v49 }
 0x83c   :  { %v708_v50 = vsel %vm512_vm3, 1.0, %v815_v34 }
 0x83d   :  { %713 = vmatmul.msk.f32.gmra.mxu0 %vm119_vm0, %v708_v50  ;;  %v626_v51 = vmul.f32 %v743_v48, %v708_v50  ;;  %v530_v9 = vmul.f32 %v708_v50, %v977_v59 }
 0x83f   :  { %v627_v52 = vsel %vm304_vm15, %v626_v51, 0.0  ;;  %v534_v10 = vsel %vm119_vm0, %v530_v9, 0.0  ;;  %v643_v51 = vrot.slane %v716_v47, 2 }
 0x840   :  { %628 = vadd.xlane.f32.xlu0 %v627_v52 }
 0x8ad   :  { %v471_v53 = vpop.f32.mrf.mxu1 }
 0x8ae   :  { %v474_v44 = vmax.f32 %v471_v53, 1e-30 }
 0x8b0   :  { %778 = vlog2.f32 %v474_v44 }
 0x8b3   :  { %v629_v23 = vpop.xlane.xlu0 %628 }
 0x8b6   :  { %v779_v55 = vpop.eup %778 }
 0x8b7   :  { %v476_v56 = vmul.f32 0.6931472, %v779_v55 }
 0x8b9   :  { %v478_v28 = vrot.slane %v476_v56, 4 }
 0x8ba   :  { %v569_v58 = vpop.f32.mrf.mxu0 }
 0x8bb   :  { %v480_v60 = vadd.f32 %v478_v28, %v446_v42  ;;  %v573_v62 = vmul.f32 %v710_v57, %v569_v58 }
 0x8bd   :  { %v481_v63 = vadd.f32 %v480_v60, %v980_v61  ;;  %v577_v0 = vsel %vm119_vm0, %v573_v62, 0.0 }
 0x8be   :  { %578 = vadd.xlane.f32.xlu2 %v577_v0 }
 0x8bf   :  { %v483_v3 = vrot.slane %v481_v63, 6 }
 0x8c1   :  { %v488_v5 = vsel %vm350_vm2, %v483_v3, %v486_v1 }
 0x8c2   :  { %v490_v7 = vadd.f32 %v743_v48, %v488_v5 }
 0x8c4   :  { %v491_v8 = vsel %vm304_vm15, %v490_v7, -inf }
 0x8c5   :  { %492 = vmax.xlane.f32.xlu1 %v491_v8 }
 0x8cd   :  { %535 = vadd.xlane.f32.xlu1 %v534_v10 }
 0x8d6   :  { %593 = vperm.xlu2 %738, %v877_v14   ;;  %v630_v14 = vmul.f32 %v629_v23, %v504_v11 }
 0x8de   :  { %741 = vset.pattern.permute.xlu2 %v811_v6 }
 0x931   :  { %v579_v61 = vpop.xlane.xlu2 %578 }
 0x932   :  { %v581_v12 = vmul.f32 %v579_v61, %v504_v11 }
 0x934   :  { %586 = vrot.lane.b32.xlu0 %v581_v12, %s816_s3 }
 0x938   :  { %v493_v13 = vpop.xlane.xlu1 %492 }
 0x939   :  { %v494_v16 = vsub.f32 %v490_v7, %v493_v13  ;;  %v594_v37 = vpop.permute.xlu2 %593 }
 0x93a   :  { %vm598_vm5 = vcmp.eq.s32.totalorder %v854_v4, %v594_v37 }
 0x93b   :  { %v495_v17 = vmul.f32 1.442695, %v494_v16  ;;  %v714_v42 = vsel %vm598_vm5, 1.0, %v815_v34 }
 0x93c   :  { %596 = vperm.xlu0 %739, %v883_v15  }
 0x93d   :  { %780 = vpow2.f32 %v495_v17 }
 0x940   :  { %v536_v24 = vpop.xlane.xlu1 %535 }
 0x941   :  { %v538_v25 = vmul.f32 %v536_v24, %v504_v11 }
 0x943   :  { %v781_v59 = vpop.eup %780 }
 0x944   :  { %v497_v18 = vsel %vm304_vm15, %v781_v59, 0.0  ;;  %742 = vset.pattern.permute.xlu0 %v811_v6 }
 0x945   :  { %498 = vadd.xlane.f32.xlu1 %v497_v18 }
 0x95e   :  { %584 = vrot.lane.b32.xlu1 %v580_v21, %s816_s3 }
 0x9a6   :  { %v587_v15 = vpop.permute.xlu0 %586 }
 0x9a7   :  { %v591_v26 = vadd.f32 %v587_v15, %v538_v25 }
 0x9a9   :  { %611 = vperm.xlu2 %741, %v591_v26  }
 0x9ae   :  { %v597_v38 = vpop.permute.xlu0 %596 }
 0x9af   :  { %vm599_vm0 = vcmp.eq.s32.totalorder %v854_v4, %v597_v38 }
 0x9b0   :  { %v715_v40 = vsel %vm599_vm0, 1.0, %v815_v34 }
 0x9b8   :  { %v499_v27 = vpop.xlane.xlu1 %498 }
 0x9b9   :  { %782 = vlog2.f32 %v499_v27 }
 0x9bf   :  { %v783_v29 = vpop.eup %782 }
 0x9c0   :  { %v501_v32 = vmul.f32 0.6931472, %v783_v29 }
 0x9c2   :  { %v502_v6 = vadd.f32 %v501_v32, %v493_v13 }
 0x9c4   :  { %v631_v35 = vsub.f32 %v630_v14, %v502_v6 }
 0x9d0   :  { %v585_v31 = vpop.permute.xlu1 %584 }
 0x9d1   :  { %v590_v33 = vadd.f32 %v585_v31, %v537_v30 }
 0x9d3   :  { %606 = vperm.xlu1 %740, %v590_v33  }
 0x9db   :  { %639 = vperm.xlu1 %740, %v631_v35  }
 0xa03   :  { %v612_v41 = vpop.permute.xlu2 %611 }
 0xa04   :  { %v615_v43 = vmul.f32 %v715_v40, %v612_v41 }
 0xa06   :  { %v618_v48 = vsel %vm616_vm7, %v615_v43, 0.0 }
 0xa45   :  { %v607_v45 = vpop.permute.xlu1 %606 }
 0xa46   :  { %v614_v46 = vmul.f32 %v714_v42, %v607_v45 }
 0xa48   :  { %v617_v49 = vsel %vm616_vm7, %v614_v46, 0.0 }
 0xa49   :  { %v619_v50 = vadd.f32 %v618_v48, %v617_v49 }
 0xa4b   :  { %v620_v52 = vrot.slane %v619_v50, 4 }
 0xa4d   :  { %v621_v53 = vadd.f32 %v620_v52, %v619_v50  ;;  %v640_v2 = vpop.permute.xlu1 %639 }
 0xa4e   :  { %v645_v44 = vmul.f32 %v643_v51, %v640_v2 }
 0xa4f   :  { %v622_v55 = vrot.slane %v621_v53, 2 }
 0xa50   :  { %v647_v54 = vrot.slane %v645_v44, 6 }
 0xa51   :  { %v623_v28 = vadd.f32 %v622_v55, %v621_v53 }
 0xa52   :  { %v650_v56 = vsel %vm649_vm8, %v647_v54, 0.0 }
 0xa53   :  { %v651_v57 = vrot.slane %v650_v56, 4  ;;  %v624_v62 = vrot.slane %v623_v28, 1 }
 0xa55   :  { %v652_v4 = vadd.f32 %v651_v57, %v650_v56  ;;  %v625_v34 = vadd.f32 %v624_v62, %v623_v28 }
 0xa57   :  { %v653_v58 = vrot.slane %v652_v4, 2 }
 0xa59   :  { %v654_v60 = vadd.f32 %v653_v58, %v652_v4 }
 0xa5b   :  { %v655_v63 = vrot.slane %v654_v60, 1 }
 0xa5d   :  { %v656_v0 = vadd.f32 %v655_v63, %v654_v60 }
 0xa5f   :  { %v657_v1 = vadd.f32 %v656_v0, %v625_v34 }
 0xa61   :  { %659 = vst.msk [vmem:[#allocation2] sm:$0x1] %vm658_vm9, %v657_v1 }
 0xa62   :  { %670 = dma.vmem_to_hbm [thread:$0]  %s666_s11, 16, %s668_s14, [#allocation3]  }
 0xa63   :  { %808 = dma.done.wait [#allocation3], 16  }
 0xa64   :  { %809 = vsyncadd [#allocation3], 4294967280 }
 0xa65   :  { %675 = vsyncpa [#allocation3], 1 }

</bundles_post_ra>
